<compile_context>
chip_gen: v7x
topology: tpu7x:2x2x1
jax: 0.10.0
libtpu: 0.0.40
codegen_flags: <defaults>
</compile_context>

<pallas_src>
import math

import jax
import jax.numpy as jnp
from jax.experimental import pallas as pl
from jax.experimental.pallas import tpu as pltpu


_SQRT_2_OVER_PI = math.sqrt(2.0 / math.pi)


def _gelu_tanh_f32(h):
    # tanh-approximation GELU (matches the PyTorch GELU module), f32 elementwise.
    c = jnp.float32(_SQRT_2_OVER_PI)
    return 0.5 * h * (1.0 + jnp.tanh(c * (h + 0.044715 * (h * h * h))))


def ffn_kernel_single(x_ref, w1_ref, b1_ref, w2_ref, b2_ref, o_ref):
    # Single pass over the full hidden dim: no scratch, direct output write.
    # x_ref: (tm, E), w1_ref: (E, H), b1_ref: (1, H), w2_ref: (H, E),
    # b2_ref: (1, E), o_ref: (tm, E)
    h = jnp.dot(x_ref[...], w1_ref[...], preferred_element_type=jnp.float32)
    h = h + b1_ref[...].astype(jnp.float32)
    g = _gelu_tanh_f32(h)
    out = jnp.dot(g.astype(w2_ref.dtype), w2_ref[...],
                  preferred_element_type=jnp.float32)
    o_ref[...] = (out + b2_ref[...].astype(jnp.float32)).astype(o_ref.dtype)


def ffn_kernel_tiled(x_ref, w1_ref, b1_ref, w2_ref, b2_ref, o_ref, acc_ref):
    # Hidden dim tiled on grid axis 1; partial second matmul accumulated in f32.
    # x_ref: (tm, E), w1_ref: (E, th), b1_ref: (1, th), w2_ref: (th, E),
    # b2_ref: (1, E), o_ref: (tm, E), acc_ref: (tm, E) f32
    h_idx = pl.program_id(1)

    @pl.when(h_idx == 0)
    def _():
        acc_ref[...] = jnp.zeros_like(acc_ref)

    h = jnp.dot(x_ref[...], w1_ref[...], preferred_element_type=jnp.float32)
    h = h + b1_ref[...].astype(jnp.float32)
    g = _gelu_tanh_f32(h)

    acc_ref[...] += jnp.dot(g.astype(w2_ref.dtype), w2_ref[...],
                            preferred_element_type=jnp.float32)

    @pl.when(h_idx == pl.num_programs(1) - 1)
    def _():
        o_ref[...] = (acc_ref[...] + b2_ref[...].astype(jnp.float32)).astype(o_ref.dtype)


def _round_up(a, b):
    return (a + b - 1) // b * b


def _vmem_single(tm, E, H, dt_bytes):
    # x/out tiles (double-buffered), full weights (conservatively 2x),
    # f32 intermediate + downcast copy.
    return (dt_bytes * (2 * 2 * tm * E + 2 * E * H + 2 * H * E)
            + 4 * tm * H + dt_bytes * tm * H)


def _vmem_tiled(tm, E, H, th, dt_bytes):
    return (dt_bytes * (2 * 2 * tm * E + 2 * E * th + 2 * th * E)
            + 4 * tm * E                      # f32 accumulator scratch
            + 4 * tm * th + dt_bytes * tm * th)  # intermediate + downcast copy


def _pick_hidden_tile(tm, E, H, dt_bytes, budget):
    """Largest multiple of 128 dividing H whose per-step VMEM fits budget."""
    best = None
    cand = (H // 128) * 128
    while cand >= 128:
        if H % cand == 0 and _vmem_tiled(tm, E, H, cand, dt_bytes) <= budget:
            best = cand
            break
        cand -= 128
    if best is None:
        best = H  # fall back to full H (block == full dim always legal)
    return best


def feed_forward(x, w1, b1, w2, b2, *, tm=256, th=None,
                 vmem_budget=40 << 20, vmem_limit=64 << 20):
    """x: (B, T, E). w1: (E, H), b1: (H,), w2: (H, E), b2: (E,). -> (B, T, E)."""
    B, T, E = x.shape
    H = w1.shape[1]
    M = B * T
    dt_bytes = jnp.dtype(x.dtype).itemsize

    # Row tile: big enough to saturate the MXU, shrunk for tiny inputs; pad M
    # so the grid always divides.
    tm_eff = min(tm, _round_up(M, 8))
    M_pad = _round_up(M, tm_eff)

    x2 = x.reshape(M, E)
    if M_pad != M:
        x2 = jnp.pad(x2, ((0, M_pad - M), (0, 0)))
    b1_2 = b1.reshape(1, H)
    b2_2 = b2.reshape(1, E)

    cost = pl.CostEstimate(
        flops=4 * M * E * H,                 # two matmuls, 2 flops per MAC
        transcendentals=M * H,               # one tanh per hidden activation
        bytes_accessed=(M * E * dt_bytes * 2
                        + (E * H + H * E + H + E) * dt_bytes),
    )
    compiler_params = lambda sem: pltpu.CompilerParams(
        dimension_semantics=sem, vmem_limit_bytes=vmem_limit)

    use_single = (th is None
                  and _vmem_single(tm_eff, E, H, dt_bytes) <= vmem_budget)

    if use_single:
        out2 = pl.pallas_call(
            ffn_kernel_single,
            out_shape=jax.ShapeDtypeStruct((M_pad, E), x.dtype),
            grid_spec=pltpu.PrefetchScalarGridSpec(
                num_scalar_prefetch=0,
                grid=(M_pad // tm_eff,),
                in_specs=[
                    pl.BlockSpec((tm_eff, E), lambda i: (i, 0)),  # x row tile
                    pl.BlockSpec((E, H),      lambda i: (0, 0)),  # W1 (resident)
                    pl.BlockSpec((1, H),      lambda i: (0, 0)),  # b1
                    pl.BlockSpec((H, E),      lambda i: (0, 0)),  # W2 (resident)
                    pl.BlockSpec((1, E),      lambda i: (0, 0)),  # b2
                ],
                out_specs=pl.BlockSpec((tm_eff, E), lambda i: (i, 0)),
            ),
            compiler_params=compiler_params(("parallel",)),
            cost_estimate=cost,
        )(x2, w1, b1_2, w2, b2_2)
    else:
        th_eff = (_pick_hidden_tile(tm_eff, E, H, dt_bytes, vmem_budget)
                  if th is None else th)
        assert H % th_eff == 0, "hidden tile must divide H"
        out2 = pl.pallas_call(
            ffn_kernel_tiled,
            out_shape=jax.ShapeDtypeStruct((M_pad, E), x.dtype),
            grid_spec=pltpu.PrefetchScalarGridSpec(
                num_scalar_prefetch=0,
                grid=(M_pad // tm_eff, H // th_eff),
                in_specs=[
                    pl.BlockSpec((tm_eff, E), lambda i, h: (i, 0)),  # x row tile
                    pl.BlockSpec((E, th_eff), lambda i, h: (0, h)),  # W1 H-tile
                    pl.BlockSpec((1, th_eff), lambda i, h: (0, h)),  # b1 H-tile
                    pl.BlockSpec((th_eff, E), lambda i, h: (h, 0)),  # W2 H-tile
                    pl.BlockSpec((1, E),      lambda i, h: (0, 0)),  # b2
                ],
                out_specs=pl.BlockSpec((tm_eff, E), lambda i, h: (i, 0)),
                scratch_shapes=[pltpu.VMEM((tm_eff, E), jnp.float32)],
            ),
            compiler_params=compiler_params(("parallel", "arbitrary")),
            cost_estimate=cost,
        )(x2, w1, b1_2, w2, b2_2)

    if M_pad != M:
        out2 = out2[:M]
    return out2.reshape(B, T, E)


def reference(x, w1, b1, w2, b2):
    h = x.astype(jnp.float32) @ w1.astype(jnp.float32) + b1.astype(jnp.float32)
    g = _gelu_tanh_f32(h)
    return (g @ w2.astype(jnp.float32) + b2.astype(jnp.float32)).astype(x.dtype)


def _make_params(key, E, H, dtype):
    k1, k2, k3, k4 = jax.random.split(key, 4)
    lim1 = 1.0 / math.sqrt(E)
    lim2 = 1.0 / math.sqrt(H)
    w1 = jax.random.uniform(k1, (E, H), minval=-lim1, maxval=lim1, dtype=dtype)
    b1 = jax.random.uniform(k2, (H,), minval=-lim1, maxval=lim1, dtype=dtype)
    w2 = jax.random.uniform(k3, (H, E), minval=-lim2, maxval=lim2, dtype=dtype)
    b2 = jax.random.uniform(k4, (E,), minval=-lim2, maxval=lim2, dtype=dtype)
    return w1, b1, w2, b2


if __name__ == "__main__":
    key = jax.random.PRNGKey(0)

    # Test 1: small config consistent with the module (emb_dim=32, hidden=128),
    # exercises the single-pass kernel.
    B, T, E = 2, 8, 32
    H = 4 * E
    kx, kp = jax.random.split(key)
    x = jax.random.normal(kx, (B, T, E), dtype=jnp.float32)
    w1, b1, w2, b2 = _make_params(kp, E, H, jnp.float32)
    out = jax.block_until_ready(feed_forward(x, w1, b1, w2, b2))
    ref = reference(x, w1, b1, w2, b2)
    assert out.shape == (B, T, E)
    assert jnp.allclose(out, ref, atol=1e-5, rtol=1e-5)

    # Test 2: slightly larger config, hidden-tiled path forced via th.
    B2, T2, E2 = 2, 8, 64
    H2 = 4 * E2
    kx2, kp2 = jax.random.split(jax.random.PRNGKey(1))
    x2 = jax.random.normal(kx2, (B2, T2, E2), dtype=jnp.float32)
    w1b, b1b, w2b, b2b = _make_params(kp2, E2, H2, jnp.float32)
    out2 = jax.block_until_ready(feed_forward(x2, w1b, b1b, w2b, b2b, th=128))
    ref2 = reference(x2, w1b, b1b, w2b, b2b)
    assert out2.shape == (B2, T2, E2)
    assert jnp.allclose(out2, ref2, atol=1e-5, rtol=1e-5)

    print("KERNEL_OK")
</pallas_src>

<mosaic_0001>
module attributes {stable_mosaic.version = 11 : i64} {
  func.func @ffn_kernel_single(%arg0: i32, %arg1: memref<16x32xf32, #tpu.memory_space<vmem>>, %arg2: memref<32x128xf32, #tpu.memory_space<vmem>>, %arg3: memref<1x128xf32, #tpu.memory_space<vmem>>, %arg4: memref<128x32xf32, #tpu.memory_space<vmem>>, %arg5: memref<1x32xf32, #tpu.memory_space<vmem>>, %arg6: memref<16x32xf32, #tpu.memory_space<vmem>>) attributes {dimension_semantics = [#tpu.dimension_semantics<parallel>], iteration_bounds = array<i64: 1>, scalar_prefetch = 0 : i64, scratch_operands = 0 : i64, tpu.core_type = #tpu.core_type<tc>, window_params = [{transform_indices = @transform_0, window_bounds = array<i64: 16, 32>}, {pipeline_mode = #tpu.pipeline_mode<synchronous>, transform_indices = @transform_1, window_bounds = array<i64: 32, 128>}, {pipeline_mode = #tpu.pipeline_mode<synchronous>, transform_indices = @transform_2, window_bounds = array<i64: 1, 128>}, {pipeline_mode = #tpu.pipeline_mode<synchronous>, transform_indices = @transform_3, window_bounds = array<i64: 128, 32>}, {pipeline_mode = #tpu.pipeline_mode<synchronous>, transform_indices = @transform_4, window_bounds = array<i64: 1, 32>}, {transform_indices = @transform_5, window_bounds = array<i64: 16, 32>}]} {
    %c0 = arith.constant 0 : index
    %c0_0 = arith.constant 0 : index
    %0 = vector.load %arg1[%c0, %c0_0] : memref<16x32xf32, #tpu.memory_space<vmem>>, vector<16x32xf32>
    %c0_1 = arith.constant 0 : index
    %c0_2 = arith.constant 0 : index
    %1 = vector.load %arg2[%c0_1, %c0_2] : memref<32x128xf32, #tpu.memory_space<vmem>>, vector<32x128xf32>
    %cst = arith.constant dense<0.000000e+00> : vector<16x128xf32>
    %2 = tpu.matmul %0, %1, %cst {dimension_numbers = #tpu.dot_dimension_numbers<[1], [0], [0], [1], [0, 0, 1, 1], [], []>} : vector<16x32xf32>, vector<32x128xf32>, vector<16x128xf32> -> vector<16x128xf32>
    %c0_3 = arith.constant 0 : index
    %c0_4 = arith.constant 0 : index
    %3 = vector.load %arg3[%c0_3, %c0_4] : memref<1x128xf32, #tpu.memory_space<vmem>>, vector<1x128xf32>
    %4 = vector.broadcast %3 : vector<1x128xf32> to vector<16x128xf32>
    %5 = arith.addf %2, %4 : vector<16x128xf32>
    %cst_5 = arith.constant 5.000000e-01 : f32
    %6 = vector.broadcast %cst_5 : f32 to vector<16x128xf32>
    %7 = arith.mulf %6, %5 : vector<16x128xf32>
    %8 = arith.mulf %5, %5 : vector<16x128xf32>
    %9 = arith.mulf %8, %5 : vector<16x128xf32>
    %cst_6 = arith.constant 4.471500e-02 : f32
    %10 = vector.broadcast %cst_6 : f32 to vector<16x128xf32>
    %11 = arith.mulf %10, %9 : vector<16x128xf32>
    %12 = arith.addf %5, %11 : vector<16x128xf32>
    %cst_7 = arith.constant 0.797884583 : f32
    %13 = vector.broadcast %cst_7 : f32 to vector<16x128xf32>
    %14 = arith.mulf %13, %12 : vector<16x128xf32>
    %15 = math.tanh %14 : vector<16x128xf32>
    %cst_8 = arith.constant 1.000000e+00 : f32
    %16 = vector.broadcast %cst_8 : f32 to vector<16x128xf32>
    %17 = arith.addf %16, %15 : vector<16x128xf32>
    %18 = arith.mulf %7, %17 : vector<16x128xf32>
    %c0_9 = arith.constant 0 : index
    %c0_10 = arith.constant 0 : index
    %19 = vector.load %arg4[%c0_9, %c0_10] : memref<128x32xf32, #tpu.memory_space<vmem>>, vector<128x32xf32>
    %cst_11 = arith.constant dense<0.000000e+00> : vector<16x32xf32>
    %20 = tpu.matmul %18, %19, %cst_11 {dimension_numbers = #tpu.dot_dimension_numbers<[1], [0], [0], [1], [0, 0, 1, 1], [], []>} : vector<16x128xf32>, vector<128x32xf32>, vector<16x32xf32> -> vector<16x32xf32>
    %c0_12 = arith.constant 0 : index
    %c0_13 = arith.constant 0 : index
    %21 = vector.load %arg5[%c0_12, %c0_13] : memref<1x32xf32, #tpu.memory_space<vmem>>, vector<1x32xf32>
    %22 = vector.broadcast %21 : vector<1x32xf32> to vector<16x32xf32>
    %23 = arith.addf %20, %22 : vector<16x32xf32>
    %c0_14 = arith.constant 0 : index
    %c0_15 = arith.constant 0 : index
    %24 = vector.load %arg6[%c0_14, %c0_15] : memref<16x32xf32, #tpu.memory_space<vmem>>, vector<16x32xf32>
    tpu.vector_store %arg6[%c0_14, %c0_15], %23 {strides = array<i32>} : memref<16x32xf32, #tpu.memory_space<vmem>>, vector<16x32xf32>,
    return
  }
  func.func @transform_0(%arg0: i32) -> (i32, i32) {
    %c0_i32 = arith.constant 0 : i32
    %c0_i32_0 = arith.constant 0 : i32
    return %arg0, %c0_i32 : i32, i32
  }
  func.func @transform_1(%arg0: i32) -> (i32, i32) {
    %c0_i32 = arith.constant 0 : i32
    %c0_i32_0 = arith.constant 0 : i32
    %c0_i32_1 = arith.constant 0 : i32
    return %c0_i32, %c0_i32_0 : i32, i32
  }
  func.func @transform_2(%arg0: i32) -> (i32, i32) {
    %c0_i32 = arith.constant 0 : i32
    %c0_i32_0 = arith.constant 0 : i32
    %c0_i32_1 = arith.constant 0 : i32
    return %c0_i32, %c0_i32_0 : i32, i32
  }
  func.func @transform_3(%arg0: i32) -> (i32, i32) {
    %c0_i32 = arith.constant 0 : i32
    %c0_i32_0 = arith.constant 0 : i32
    %c0_i32_1 = arith.constant 0 : i32
    return %c0_i32, %c0_i32_0 : i32, i32
  }
  func.func @transform_4(%arg0: i32) -> (i32, i32) {
    %c0_i32 = arith.constant 0 : i32
    %c0_i32_0 = arith.constant 0 : i32
    %c0_i32_1 = arith.constant 0 : i32
    return %c0_i32, %c0_i32_0 : i32, i32
  }
  func.func @transform_5(%arg0: i32) -> (i32, i32) {
    %c0_i32 = arith.constant 0 : i32
    %c0_i32_0 = arith.constant 0 : i32
    return %arg0, %c0_i32 : i32, i32
  }
}

</mosaic_0001>

<bundles_post_ra>
// kernel: tpu_custom_call.1
= control target key start
LH: loop header
LB: loop body
LE: loop exit
PB: predicated region body
PF: predicated region fallthrough
CT: control target
= control target key end

     0   :  { %10 = vsyncpa [#allocation3], 0  ;;  %s716_s0 = inlined_call_operand.hbm [shape: f32[16,32], index: 0, kind: input, shape index: {}]   ;;  %s717_s1 = inlined_call_operand.hbm [shape: f32[32,128], index: 1, kind: input, shape index: {}]   ;;  %s718_s2 = inlined_call_operand.hbm [shape: f32[1,128], index: 2, kind: input, shape index: {}]   ;;  %s719_s3 = inlined_call_operand.hbm [shape: f32[128,32], index: 3, kind: input, shape index: {}]   ;;  %s720_s4 = inlined_call_operand.hbm [shape: f32[1,32], index: 4, kind: input, shape index: {}]   ;;  %s721_s5 = inlined_call_operand.hbm [shape: f32[16,32], index: 5, kind: output, shape index: {}]  }
   0x1   :  { %11 = vsyncpa [#allocation6], 0 }
   0x2   :  { %12 = vsyncpa [#allocation9], 0 }
   0x3   :  { %13 = vsyncpa [#allocation4], 0  ;;  %s583_s18 = smov [#allocation5]   ;;  %s584_s20 = smov [#allocation8]  }
   0x4   :  { %s31_s19 = sshll.u32 %s583_s18, 4  ;;  %s53_s21 = sshll.u32 %s584_s20, 4  ;;  %s32_s19 = int_to_ptr.vmem [resolvable:$true] %s31_s19  ;;  %s621_s21 = int_to_ptr.vmem [resolvable:$true] %s53_s21 }
   0x5   :  { %s443_s24 = scalar_lea.hbm %s717_s1, 512 }
   0x6   :  { %p444_p0 = scmp.ne.s32.totalorder %s717_s1, %s443_s24  ;;  %p447_p1 = scmp.lt.u32.totalorder %s443_s24, %s717_s1 }
   0x8   :  { %p449_p2 = pnand %p447_p1, %p444_p0 }
   0xa   :  { %452 = shalt.err (!%p449_p2)
}
   0xb   :  { %s453_s29 = scalar_lea.vmem %s32_s19, 512  ;;  %p458_p4 = scmp.lt.s32.totalorder %s32_s19, %s32_s19 }
   0xc   :  { %p454_p3 = scmp.ne.s32.totalorder %s32_s19, %s453_s29  ;;  %p459_p5 = scmp.lt.s32.totalorder %s453_s29, %s453_s29 }
   0xe   :  { %p460_p6 = por %p459_p5, %p458_p4 }
  0x10   :  { %p461_p7 = pnand %p460_p6, %p454_p3 }
  0x12   :  { %464 = shalt.err (!%p461_p7)
}
  0x13   :  { %s585_s30 = smov 128   ;;  %s586_s6 = smov 8  }
  0x14   :  { %37 = dma.hbm_to_vmem [thread:$0]  %s717_s1, 512, %s32_s19, [#allocation6], %s585_s30, %s585_s30, %s586_s6  }
  0x15   :  { %s465_s11 = scalar_lea.hbm %s719_s3, 2048 }
  0x16   :  { %p466_p8 = scmp.ne.s32.totalorder %s719_s3, %s465_s11  ;;  %p469_p9 = scmp.lt.u32.totalorder %s465_s11, %s719_s3 }
  0x18   :  { %p471_p10 = pnand %p469_p9, %p466_p8 }
  0x1a   :  { %474 = shalt.err (!%p471_p10)
}
  0x1b   :  { %s475_s16 = scalar_lea.vmem %s621_s21, 2048  ;;  %p480_p12 = scmp.lt.s32.totalorder %s621_s21, %s621_s21 }
  0x1c   :  { %p476_p11 = scmp.ne.s32.totalorder %s621_s21, %s475_s16  ;;  %p481_p13 = scmp.lt.s32.totalorder %s475_s16, %s475_s16 }
  0x1e   :  { %p482_p0 = por %p481_p13, %p480_p12 }
  0x20   :  { %p483_p1 = pnand %p482_p0, %p476_p11 }
  0x22   :  { %486 = shalt.err (!%p483_p1)
}
  0x23   :  { %59 = dma.hbm_to_vmem [thread:$0]  %s719_s3, 2048, %s621_s21, [#allocation9], %s585_s30, %s585_s30, %s586_s6  }
  0x24   :  { %s587_s18 = smov [#allocation2]   ;;  %s588_s20 = smov [#allocation7]  }
  0x25   :  { %s19_s19 = sshll.u32 %s587_s18, 4  ;;  %s44_s22 = sshll.u32 %s588_s20, 4  ;;  %s20_s19 = int_to_ptr.vmem [resolvable:$true] %s19_s19  ;;  %s45_s22 = int_to_ptr.vmem [resolvable:$true] %s44_s22 }
  0x26   :  { %s487_s25 = scalar_lea.hbm %s716_s0, 256 }
  0x27   :  { %p488_p2 = scmp.ne.s32.totalorder %s716_s0, %s487_s25  ;;  %p491_p3 = scmp.lt.u32.totalorder %s487_s25, %s716_s0 }
  0x29   :  { %p493_p4 = pnand %p491_p3, %p488_p2 }
  0x2b   :  { %496 = shalt.err (!%p493_p4)
}
  0x2c   :  { %s497_s3 = scalar_lea.vmem %s20_s19, 256  ;;  %p502_p6 = scmp.lt.s32.totalorder %s20_s19, %s20_s19 }
  0x2d   :  { %p498_p5 = scmp.ne.s32.totalorder %s20_s19, %s497_s3  ;;  %p503_p7 = scmp.lt.s32.totalorder %s497_s3, %s497_s3 }
  0x2f   :  { %p504_p8 = por %p503_p7, %p502_p6 }
  0x31   :  { %p505_p9 = pnand %p504_p8, %p498_p5 }
  0x33   :  { %508 = shalt.err (!%p505_p9)
}
  0x34   :  { %25 = dma.hbm_to_vmem [thread:$0]  %s716_s0, 256, %s20_s19, [#allocation3], %s585_s30, %s585_s30, %s586_s6  }
  0x35   :  { %s509_s10 = scalar_lea.hbm %s718_s2, 16 }
  0x36   :  { %p510_p10 = scmp.ne.s32.totalorder %s718_s2, %s509_s10  ;;  %p513_p11 = scmp.lt.u32.totalorder %s509_s10, %s718_s2 }
  0x38   :  { %p515_p12 = pnand %p513_p11, %p510_p10 }
  0x3a   :  { %518 = shalt.err (!%p515_p12)
}
  0x3b   :  { %s519_s15 = scalar_lea.vmem %s45_s22, 16  ;;  %s523_s16 = scalar_lea.vmem %s45_s22, 32 }
  0x3c   :  { %p520_p13 = scmp.ne.s32.totalorder %s45_s22, %s519_s15  ;;  %p524_p0 = scmp.lt.s32.totalorder %s45_s22, %s45_s22 }
  0x3d   :  { %p525_p1 = scmp.lt.s32.totalorder %s523_s16, %s519_s15 }
  0x3f   :  { %p526_p2 = por %p525_p1, %p524_p0 }
  0x41   :  { %p527_p3 = pnand %p526_p2, %p520_p13 }
  0x43   :  { %530 = shalt.err (!%p527_p3)
}
  0x44   :  { %47 = dma.hbm_to_vmem [thread:$0]  %s718_s2, 16, %s45_s22, [#allocation6]  }
  0x45   :  { %s589_s17 = smov [#allocation10]   ;;  %s531_s23 = scalar_lea.hbm %s720_s4, 16 }
  0x46   :  { %s66_s18 = sshll.u32 %s589_s17, 4  ;;  %p532_p4 = scmp.ne.s32.totalorder %s720_s4, %s531_s23  ;;  %s67_s18 = int_to_ptr.vmem [resolvable:$true] %s66_s18 }
  0x47   :  { %p535_p5 = scmp.lt.u32.totalorder %s531_s23, %s720_s4 }
  0x49   :  { %p537_p6 = pnand %p535_p5, %p532_p4 }
  0x4b   :  { %540 = shalt.err (!%p537_p6)
}
  0x4c   :  { %s541_s28 = scalar_lea.vmem %s67_s18, 16  ;;  %s545_s2 = scalar_lea.vmem %s67_s18, 32 }
  0x4d   :  { %p542_p7 = scmp.ne.s32.totalorder %s67_s18, %s541_s28  ;;  %p546_p8 = scmp.lt.s32.totalorder %s67_s18, %s67_s18 }
  0x4e   :  { %p547_p9 = scmp.lt.s32.totalorder %s545_s2, %s541_s28 }
  0x50   :  { %p548_p10 = por %p547_p9, %p546_p8 }
  0x52   :  { %p549_p11 = pnand %p548_p10, %p542_p7 }
  0x54   :  { %552 = shalt.err (!%p549_p11)
}
  0x55   :  { %69 = dma.hbm_to_vmem [thread:$0]  %s720_s4, 16, %s67_s18, [#allocation9]  }
  0x56   :  { %575 = dma.done.wait [#allocation3], 256  }
  0x57   :  { %576 = vsyncadd [#allocation3], 4294967040 }
  0x58   :  { %577 = dma.done.wait [#allocation6], 528  }
  0x59   :  { %578 = vsyncadd [#allocation6], 4294966768 }
  0x5a   :  { %579 = dma.done.wait [#allocation9], 2064  }
  0x5b   :  { %580 = vsyncadd [#allocation9], 4294965232  ;;  %vm98_vm0 = vcmask 261120   ;;  %v87_v0 = vld [vmem:[#allocation5] sm:$0xff]  ;;  %v88_v1 = vld [vmem:[#allocation5 + $0x8] sm:$0xff]  ;;  %s590_s4 = smov [#allocation11]  }
  0x5c   :  { %v89_v2 = vld [vmem:[#allocation5 + $0x10] sm:$0xff]  ;;  %v391_v3 = vpack.c.bf16 %v88_v1, %v87_v0  ;;  %v90_v4 = vld [vmem:[#allocation5 + $0x18] sm:$0xff]  ;;  %v198_v7 = vld [vmem:[#allocation8] sm:$0xff]  ;;  %s303_s3 = sshll.u32 %s590_s4, 4  ;;  %s304_s3 = int_to_ptr.vmem [resolvable:$true] %s303_s3 }
  0x5d   :  { %v85_v5 = vld [vmem:[#allocation2] sm:$0xff]  ;;  %v395_v6 = vpack.c.bf16 %v90_v4, %v89_v2  ;;  %v86_v10 = vld [vmem:[#allocation2 + $0x8] sm:$0xff]  ;;  %v202_v14 = vld [vmem:[#allocation8 + $0x20] sm:$0xff]  ;;  %s553_s21 = scalar_lea.vmem %s304_s3, 256  ;;  %p558_p13 = scmp.lt.s32.totalorder %s304_s3, %s304_s3 }
  0x5e   :  { %353 = vmatprep.mubr.msk.f32.mxu0 %vm98_vm0, %v85_v5  ;;  %v199_v8 = vld [vmem:[#allocation8 + $0x8] sm:$0xff]  ;;  %392 = vmatprep.subr.bf16.mxu0 %v391_v3  ;;  %v200_v11 = vld [vmem:[#allocation8 + $0x10] sm:$0xff]  ;;  %v201_v12 = vld [vmem:[#allocation8 + $0x18] sm:$0xff]  ;;  %p554_p12 = scmp.ne.s32.totalorder %s304_s3, %s553_s21  ;;  %p559_p0 = scmp.lt.s32.totalorder %s553_s21, %s553_s21 }
  0x5f   :  { %v399_v9 = vpack.c.bf16 %v199_v8, %v198_v7  ;;  %394 = vmatpush3.bf16.msra.mxu0 %v391_v3  ;;  %v403_v13 = vpack.c.bf16 %v201_v12, %v200_v11  ;;  %v203_v15 = vld [vmem:[#allocation8 + $0x28] sm:$0xff]  ;;  %v204_v17 = vld [vmem:[#allocation8 + $0x30] sm:$0xff]  ;;  %v205_v18 = vld [vmem:[#allocation8 + $0x38] sm:$0xff] }
  0x60   :  { %396 = vmatprep.subr.bf16.mxu0 %v395_v6  ;;  %v407_v16 = vpack.c.bf16 %v203_v15, %v202_v14  ;;  %v411_v19 = vpack.c.bf16 %v205_v18, %v204_v17  ;;  %v206_v20 = vld [vmem:[#allocation8 + $0x40] sm:$0xff]  ;;  %v207_v21 = vld [vmem:[#allocation8 + $0x48] sm:$0xff]  ;;  %v208_v22 = vld [vmem:[#allocation8 + $0x50] sm:$0xff]  ;;  %p560_p1 = por %p559_p0, %p558_p13 }
  0x61   :  { %400 = vmatprep.subr.bf16.mxu1 %v399_v9  ;;  %v415_v23 = vpack.c.bf16 %v207_v21, %v206_v20  ;;  %v209_v24 = vld [vmem:[#allocation8 + $0x58] sm:$0xff]  ;;  %v210_v26 = vld [vmem:[#allocation8 + $0x60] sm:$0xff]  ;;  %v211_v27 = vld [vmem:[#allocation8 + $0x68] sm:$0xff] }
  0x62   :  { %402 = vmatpush3.bf16.msra.mxu1 %v399_v9  ;;  %v419_v25 = vpack.c.bf16 %v209_v24, %v208_v22  ;;  %v423_v28 = vpack.c.bf16 %v211_v27, %v210_v26  ;;  %v212_v29 = vld [vmem:[#allocation8 + $0x70] sm:$0xff]  ;;  %v213_v30 = vld [vmem:[#allocation8 + $0x78] sm:$0xff]  ;;  %v320_v55 = vld [vmem:[#allocation10] ss:$0 sm:$0xff]  ;;  %p561_p2 = pnand %p560_p1, %p554_p12 }
  0x63   :  { %398 = vmatpush3.bf16.msra.mxu0 %v395_v6  ;;  %404 = vmatprep.subr.bf16.mxu1 %v403_v13  ;;  %v427_v31 = vpack.c.bf16 %v213_v30, %v212_v29  ;;  %v317_v32 = vld [vmem:[#allocation7] ss:$0 sm:$0xff] }
  0x66   :  { %354 = vmatmul.mubr.msk.f32.vlgmr.msra.gmra.mrb[0].mxu0 %vm98_vm0, %v86_v10  ;;  %406 = vmatpush3.bf16.msra.mxu1 %v403_v13 }
  0x67   :  { %408 = vmatprep.subr.bf16.mxu1 %v407_v16 }
  0x6a   :  { %410 = vmatpush3.bf16.msra.mxu1 %v407_v16 }
  0x6b   :  { %412 = vmatprep.subr.bf16.mxu1 %v411_v19 }
  0x6e   :  { %414 = vmatpush3.bf16.msra.mxu1 %v411_v19 }
  0x6f   :  { %416 = vmatprep.subr.bf16.mxu1 %v415_v23 }
  0x72   :  { %418 = vmatpush3.bf16.msra.mxu1 %v415_v23 }
  0x73   :  { %420 = vmatprep.subr.bf16.mxu1 %v419_v25 }
  0x76   :  { %422 = vmatpush3.bf16.msra.mxu1 %v419_v25 }
  0x77   :  { %424 = vmatprep.subr.bf16.mxu1 %v423_v28 }
  0x7a   :  { %426 = vmatpush3.bf16.msra.mxu1 %v423_v28 }
  0x7b   :  { %428 = vmatprep.subr.bf16.mxu1 %v427_v31 }
  0x7e   :  { %430 = vmatpush3.bf16.msra.mxu1 %v427_v31 }
 0x139   :  { %v355_v33 = vpop.f32.mrb[0].mxu0 }
 0x13a   :  { %v177_v34 = vadd.f32 %v355_v33, %v317_v32  ;;  %v171_v35 = vpop.f32.mrb[1].mxu0 }
 0x13b   :  { %v172_v36 = vadd.f32 %v317_v32, %v171_v35 }
 0x13c   :  { %v183_v37 = vmul.f32 %v177_v34, %v177_v34  ;;  %v181_v52 = vmul.f32 0.5, %v177_v34 }
 0x13d   :  { %v182_v38 = vmul.f32 %v172_v36, %v172_v36  ;;  %v180_v50 = vmul.f32 0.5, %v172_v36 }
 0x13e   :  { %v185_v39 = vmul.f32 %v183_v37, %v177_v34 }
 0x13f   :  { %v184_v40 = vmul.f32 %v182_v38, %v172_v36 }
 0x140   :  { %v187_v41 = vmul.f32 0.044715, %v185_v39 }
 0x141   :  { %v186_v42 = vmul.f32 0.044715, %v184_v40 }
 0x142   :  { %v189_v43 = vadd.f32 %v187_v41, %v177_v34 }
 0x143   :  { %v188_v44 = vadd.f32 %v186_v42, %v172_v36 }
 0x144   :  { %v191_v45 = vmul.f32 0.7978846, %v189_v43 }
 0x145   :  { %v190_v46 = vmul.f32 0.7978846, %v188_v44 }
 0x146   :  { %439 = vtanh.f32 %v191_v45 }
 0x147   :  { %441 = vtanh.f32 %v190_v46 }
 0x150   :  { %v440_v47 = vpop.eup %439 }
 0x151   :  { %v442_v48 = vpop.eup %441  ;;  %v195_v49 = vadd.f32 1.0, %v440_v47 }
 0x152   :  { %v194_v51 = vadd.f32 1.0, %v442_v48 }
 0x153   :  { %v197_v54 = vmul.f32 %v195_v49, %v181_v52 }
 0x154   :  { %v196_v53 = vmul.f32 %v194_v51, %v180_v50 }
 0x156   :  { %388 = vmatprep.mubr.f32.mxu1 %v196_v53 }
 0x157   :  { %389 = vmatmul.mubr.f32.vlgmr.msra.gmra.mrb[0].mxu1 %v197_v54 }
 0x22a   :  { %v390_v56 = vpop.f32.mrb[0].mxu1 }
 0x22b   :  { %v293_v57 = vadd.f32 %v390_v56, %v320_v55  ;;  %v287_v58 = vpop.f32.mrb[1].mxu1 }
 0x22c   :  { %v288_v59 = vadd.f32 %v320_v55, %v287_v58 }
 0x22d   :  { %297 = vst.msk [vmem:[#allocation11 + $0x8] sm:$0xff] %vm98_vm0, %v293_v57 }
 0x22e   :  { %296 = vst.msk [vmem:[#allocation11] sm:$0xff] %vm98_vm0, %v288_v59 }
 0x22f   :  { %564 = shalt.err (!%p561_p2)
}
 0x230   :  { %s565_s9 = scalar_lea.hbm %s721_s5, 256 }
 0x231   :  { %p566_p3 = scmp.ne.s32.totalorder %s721_s5, %s565_s9  ;;  %p569_p4 = scmp.lt.u32.totalorder %s565_s9, %s721_s5 }
 0x233   :  { %p571_p5 = pnand %p569_p4, %p566_p3 }
 0x235   :  { %574 = shalt.err (!%p571_p5)
}
 0x236   :  { %309 = dma.vmem_to_hbm [thread:$0]  %s304_s3, 256, %s721_s5, [#allocation4], %s585_s30, %s585_s30, %s586_s6  }
 0x237   :  { %581 = dma.done.wait [#allocation4], 256  }
 0x238   :  { %582 = vsyncadd [#allocation4], 4294967040 }
 0x239   :  { %313 = vsyncpa [#allocation3], 1 }
 0x23a   :  { %314 = vsyncpa [#allocation6], 1 }
 0x23b   :  { %315 = vsyncpa [#allocation9], 1 }
 0x23c   :  { %316 = vsyncpa [#allocation4], 1 }

</bundles_post_ra>
